<compile_context>
chip_gen: v5e
topology: v5e:2x2
jax: 0.10.0
libtpu: 0.0.40
codegen_flags: <defaults>
</compile_context>

<pallas_src>
import functools

import numpy as np
import jax
import jax.numpy as jnp
from jax.experimental import pallas as pl
from jax.experimental.pallas import tpu as pltpu


def _linear_kernel(x_ref, w_ref, b_ref, o_ref):
    # x_ref: [TILE_N, D] (bf16 or f32)  w_ref: [D, C] (pre-transposed)  b_ref: [1, C] f32
    acc = jnp.dot(x_ref[...], w_ref[...], preferred_element_type=jnp.float32)
    o_ref[...] = (acc + b_ref[...]).astype(o_ref.dtype)


def _roundup(x, m):
    return -(-x // m) * m


def _device_vmem_budgets():
    """(pipeline_budget_bytes, vmem_limit_bytes), generation-aware."""
    cap = 64 << 20  # conservative default: v7x physical VMEM
    try:
        if hasattr(pltpu, "get_tpu_info"):
            info = pltpu.get_tpu_info()
            cap = int(getattr(info, "vmem_capacity_bytes", cap) or cap)
    except Exception:
        pass
    if cap >= (128 << 20):        # v5e / v6e: 128 MiB physical
        return 64 << 20, 96 << 20
    return 40 << 20, 56 << 20      # v7x: 64 MiB physical -> tighter accounting


def _pick_tile_n(n, d, c, x_itemsize, out_itemsize, budget_bytes, sublane):
    """Largest row tile whose double-buffered physical VMEM footprint fits budget."""
    d_lanes = _roundup(d, 128)     # lane padding of the x tile
    c_lanes = _roundup(c, 128)     # lane padding of the out tile
    # 2x (double-buffered) x tile + 2x out tile, physical bytes per row.
    bytes_per_row = 2 * d_lanes * x_itemsize + 2 * c_lanes * out_itemsize
    rows = budget_bytes // bytes_per_row
    rows = max(sublane, (rows // sublane) * sublane)
    n_pad = _roundup(n, sublane)
    tile = min(rows, n_pad)
    # Keep >= 2 grid steps when N allows: enables megacore sharding on v7x and
    # DMA/compute overlap.  For large N the byte budget already dominates.
    if n_pad >= 2 * sublane:
        tile = min(tile, _roundup((n_pad + 1) // 2, sublane))
    return tile


@functools.partial(jax.jit, static_argnames=("cast_to_bf16", "tile_rows"))
def logistic_regression_forward(x, weight, bias, *, cast_to_bf16=True, tile_rows=None):
    """x: [N, D] f32, weight: [C, D] f32 (PyTorch layout), bias: [C] f32 -> [N, C] f32."""
    n, d = x.shape
    c = weight.shape[0]
    out_dtype = x.dtype

    # Pre-transpose weight once ([C, D] -> [D, C]) so the kernel is a plain NT matmul.
    w_t = weight.T
    if cast_to_bf16:
        x_in = x.astype(jnp.bfloat16)
        w_in = w_t.astype(jnp.bfloat16)
    else:
        x_in = x
        w_in = w_t
    b2 = bias.reshape(1, c).astype(jnp.float32)   # f32 bias add regardless of input dtype

    sublane = 32 // jnp.dtype(x_in.dtype).itemsize      # 8 for f32, 16 for bf16
    budget, vmem_limit = _device_vmem_budgets()
    if tile_rows is not None:
        tile_n = max(sublane, _roundup(int(tile_rows), sublane))
        tile_n = min(tile_n, _roundup(n, sublane))
    else:
        tile_n = _pick_tile_n(
            n, d, c,
            jnp.dtype(x_in.dtype).itemsize, jnp.dtype(out_dtype).itemsize,
            budget, sublane,
        )
    grid = (pl.cdiv(n, tile_n),)

    return pl.pallas_call(
        _linear_kernel,
        out_shape=jax.ShapeDtypeStruct((n, c), out_dtype),
        grid_spec=pltpu.PrefetchScalarGridSpec(
            num_scalar_prefetch=0,
            grid=grid,
            in_specs=[
                pl.BlockSpec((tile_n, d), lambda i: (i, 0)),   # stream x rows
                pl.BlockSpec((d, c), lambda i: (0, 0)),        # resident weight [D, C]
                pl.BlockSpec((1, c), lambda i: (0, 0)),        # resident bias
            ],
            out_specs=pl.BlockSpec((tile_n, c), lambda i: (i, 0)),
        ),
        compiler_params=pltpu.CompilerParams(
            dimension_semantics=("parallel",),                 # megacore on v7x
            vmem_limit_bytes=vmem_limit,
        ),
    )(x_in, w_in, b2)


if __name__ == "__main__":
    # Small shapes consistent with the module: batch=16 nodes, num_dim=32, num_class=8.
    N, NUM_DIM, NUM_CLASS = 16, 32, 8

    key = jax.random.PRNGKey(0)
    kx, kw, kb = jax.random.split(key, 3)

    # Deterministic nn.Linear-style init: U(-1/sqrt(num_dim), 1/sqrt(num_dim)).
    bound = 1.0 / (NUM_DIM ** 0.5)
    weight = jax.random.uniform(kw, (NUM_CLASS, NUM_DIM), jnp.float32, -bound, bound)
    bias = jax.random.uniform(kb, (NUM_CLASS,), jnp.float32, -bound, bound)

    # `g` (the graph) is unused by the forward pass, matching the PyTorch module.
    g = None

    def np_ref(xa, wa, ba, bf16):
        xn = np.asarray(xa, dtype=np.float32)
        wn = np.asarray(wa, dtype=np.float32)
        if bf16:
            xn = np.asarray(jnp.asarray(xn).astype(jnp.bfloat16), dtype=np.float32)
            wn = np.asarray(jnp.asarray(wn).astype(jnp.bfloat16), dtype=np.float32)
        return xn @ wn.T + np.asarray(ba, dtype=np.float32)

    # Case 1: default bf16-input path, single tile.
    x = jax.random.normal(kx, (N, NUM_DIM), dtype=jnp.float32)
    logits = logistic_regression_forward(x, weight, bias)
    jax.block_until_ready(logits)
    assert logits.shape == (N, NUM_CLASS)
    assert np.allclose(np.asarray(logits), np_ref(x, weight, bias, True), atol=1e-3, rtol=1e-3)
    assert np.allclose(np.asarray(logits), np_ref(x, weight, bias, False), atol=5e-2, rtol=5e-2)

    # Case 2: multi-step grid with a ragged final block (forced 16-row tiles)
    # to exercise the tiled/pipelined path.  Padded rows in the last block only
    # produce discarded padded output rows, so semantics are unchanged.
    N2 = 100
    x2 = jax.random.normal(kx, (N2, NUM_DIM), dtype=jnp.float32)
    logits2 = logistic_regression_forward(x2, weight, bias, tile_rows=16)
    jax.block_until_ready(logits2)
    assert logits2.shape == (N2, NUM_CLASS)
    assert np.allclose(np.asarray(logits2), np_ref(x2, weight, bias, True), atol=1e-3, rtol=1e-3)

    # Case 3: exact-semantics f32 path (no bf16 cast), tight tolerance.
    logits3 = logistic_regression_forward(x2, weight, bias, cast_to_bf16=False)
    jax.block_until_ready(logits3)
    assert np.allclose(np.asarray(logits3), np_ref(x2, weight, bias, False), atol=1e-4, rtol=1e-4)

    print("KERNEL_OK")
</pallas_src>

<mosaic_0001>
module attributes {stable_mosaic.version = 11 : i64} {
  func.func @_linear_kernel(%arg0: i32, %arg1: memref<16x32xbf16, #tpu.memory_space<vmem>>, %arg2: memref<32x8xbf16, #tpu.memory_space<vmem>>, %arg3: memref<1x8xf32, #tpu.memory_space<vmem>>, %arg4: memref<16x8xf32, #tpu.memory_space<vmem>>) attributes {dimension_semantics = [#tpu.dimension_semantics<parallel>], iteration_bounds = array<i64: 1>, scalar_prefetch = 0 : i64, scratch_operands = 0 : i64, tpu.core_type = #tpu.core_type<tc>, window_params = [{transform_indices = @transform_0, window_bounds = array<i64: 16, 32>}, {pipeline_mode = #tpu.pipeline_mode<synchronous>, transform_indices = @transform_1, window_bounds = array<i64: 32, 8>}, {pipeline_mode = #tpu.pipeline_mode<synchronous>, transform_indices = @transform_2, window_bounds = array<i64: 1, 8>}, {transform_indices = @transform_3, window_bounds = array<i64: 16, 8>}]} {
    %c0 = arith.constant 0 : index
    %c0_0 = arith.constant 0 : index
    %0 = vector.load %arg1[%c0, %c0_0] : memref<16x32xbf16, #tpu.memory_space<vmem>>, vector<16x32xbf16>
    %c0_1 = arith.constant 0 : index
    %c0_2 = arith.constant 0 : index
    %1 = vector.load %arg2[%c0_1, %c0_2] : memref<32x8xbf16, #tpu.memory_space<vmem>>, vector<32x8xbf16>
    %cst = arith.constant dense<0.000000e+00> : vector<16x8xf32>
    %2 = tpu.matmul %0, %1, %cst {dimension_numbers = #tpu.dot_dimension_numbers<[1], [0], [0], [1], [0, 0, 1, 1], [], []>} : vector<16x32xbf16>, vector<32x8xbf16>, vector<16x8xf32> -> vector<16x8xf32>
    %c0_3 = arith.constant 0 : index
    %c0_4 = arith.constant 0 : index
    %3 = vector.load %arg3[%c0_3, %c0_4] : memref<1x8xf32, #tpu.memory_space<vmem>>, vector<1x8xf32>
    %4 = vector.broadcast %3 : vector<1x8xf32> to vector<16x8xf32>
    %5 = arith.addf %2, %4 : vector<16x8xf32>
    %c0_5 = arith.constant 0 : index
    %c0_6 = arith.constant 0 : index
    %6 = vector.load %arg4[%c0_5, %c0_6] : memref<16x8xf32, #tpu.memory_space<vmem>>, vector<16x8xf32>
    tpu.vector_store %arg4[%c0_5, %c0_6], %5 {strides = array<i32>} : memref<16x8xf32, #tpu.memory_space<vmem>>, vector<16x8xf32>,
    return
  }
  func.func @transform_0(%arg0: i32) -> (i32, i32) {
    %c0_i32 = arith.constant 0 : i32
    %c0_i32_0 = arith.constant 0 : i32
    return %arg0, %c0_i32 : i32, i32
  }
  func.func @transform_1(%arg0: i32) -> (i32, i32) {
    %c0_i32 = arith.constant 0 : i32
    %c0_i32_0 = arith.constant 0 : i32
    %c0_i32_1 = arith.constant 0 : i32
    return %c0_i32, %c0_i32_0 : i32, i32
  }
  func.func @transform_2(%arg0: i32) -> (i32, i32) {
    %c0_i32 = arith.constant 0 : i32
    %c0_i32_0 = arith.constant 0 : i32
    %c0_i32_1 = arith.constant 0 : i32
    return %c0_i32, %c0_i32_0 : i32, i32
  }
  func.func @transform_3(%arg0: i32) -> (i32, i32) {
    %c0_i32 = arith.constant 0 : i32
    %c0_i32_0 = arith.constant 0 : i32
    return %arg0, %c0_i32 : i32, i32
  }
}

</mosaic_0001>

<bundles_post_ra>
// kernel: logistic_regression_forward.1
= control target key start
LH: loop header
LB: loop body
LE: loop exit
PB: predicated region body
PF: predicated region fallthrough
CT: control target
= control target key end

     0   :  { %vm42_vm0 = vcmask 261120   ;;  %vm60_vm1 = vcmask 64512   ;;  %s122_s1 = inlined_call_operand.vmem [shape: bf16[32,8], index: 1, kind: input, shape index: {}]   ;;  %s123_s2 = inlined_call_operand.vmem [shape: f32[1,8], index: 2, kind: input, shape index: {}]   ;;  %s124_s0 = inlined_call_operand.vmem [shape: bf16[16,32], index: 0, kind: input, shape index: {}]   ;;  %s125_s3 = inlined_call_operand.vmem [shape: f32[16,8], index: 3, kind: output, shape index: {}]  }
   0x1   :  { %v82_v0 = vld [vmem:[%s122_s1 + $0x8] sm:$0xff]  ;;  %v81_v1 = vld [vmem:[%s122_s1] sm:$0xff] }
   0x2   :  { %52 = vmatpush.bf16.msra.mxu0 %v82_v0  ;;  %v80_v2 = vld [vmem:[%s124_s0] sm:$0xff] }
   0x3   :  { %v83_v3 = vld [vmem:[%s123_s2] ss:$0 sm:$0xff] }
   0x6   :  { %53 = vmatpush.bf16.msra.mxu0 %v81_v1 }
   0x9   :  { %79 = vmatmul.msk.bf16.vlgmr.msra.gmra.mxu0 %vm42_vm0, %v80_v2 }
  0x86   :  { %v55_v4 = vpop.f32.mrf.mxu0 }
  0x87   :  { %v56_v5 = vadd.f32 %v83_v3, %v55_v4 }
  0x89   :  { %61 = vst.msk [vmem:[%s125_s3] sm:$0xff] %vm60_vm1, %v56_v5 }
  0x8e   :  { %v57_v6 = vpop.f32.mrf.mxu0 }
  0x8f   :  { %v58_v7 = vadd.f32 %v83_v3, %v57_v6 }
  0x91   :  { %62 = vst.msk [vmem:[%s125_s3 + $0x8] sm:$0xff] %vm60_vm1, %v58_v7 }

</bundles_post_ra>
